<compile_context>
chip_gen: v6e
topology: v6e:2x2x1
jax: 0.10.0
libtpu: 0.0.40
codegen_flags: <defaults>
</compile_context>

<pallas_src>
import jax
import jax.numpy as jnp
from jax.experimental import pallas as pl
from jax.experimental.pallas import tpu as pltpu

SEQ_LEN = 6   # LSTMNet(seq_len=6)
HIDDEN = 1    # hidden_size=1
INPUT = 1     # input_size=1
OUTPUT = 1    # output_size=1
SUBLANES = 8  # f32 vreg sublane count

# packed parameter layout (f32[23]), PyTorch nn.LSTM gate order (i, f, g, o):
#   [0:4]   w_ih  (w_ii, w_if, w_ig, w_io)
#   [4:8]   w_hh  (w_hi, w_hf, w_hg, w_ho)
#   [8:12]  b_ih
#   [12:16] b_hh
#   [16:22] fc_w  (one weight per flattened hidden state, t-major)
#   [22]    fc_b
N_PACKED = 4 + 4 + 4 + 4 + SEQ_LEN * HIDDEN + OUTPUT  # = 23


def _sigmoid(z):
    # tanh form: one EUP push per sigmoid instead of exp + reciprocal (two).
    return 0.5 * jnp.tanh(0.5 * z) + 0.5


def lstm_fc_kernel(p_ref, x_ref, o_ref):
    """One batch tile.

    x_ref : (T=6, 8, Bl) f32 in VMEM -- batch packed onto sublanes (8) and
            lanes (Bl), so the serial recurrence uses full vregs.
    p_ref : (23,) f32 in SMEM (scalar-prefetched packed parameters).
    o_ref : (8, Bl) f32 sublane+lane-dense output slab.
    """
    Bl = x_ref.shape[2]
    state_shape = (SUBLANES, Bl)

    w_ii, w_if, w_ig, w_io = p_ref[0], p_ref[1], p_ref[2], p_ref[3]
    b_i = p_ref[8] + p_ref[12]
    b_f = p_ref[9] + p_ref[13]
    b_g = p_ref[10] + p_ref[14]
    b_o = p_ref[11] + p_ref[15]

    # Hoist the recurrent-weight scalar->vreg broadcasts out of the unrolled
    # recurrence (JAX does not CSE broadcast_in_dim across the 6 steps).
    w_hi = jnp.broadcast_to(p_ref[4], state_shape)
    w_hf = jnp.broadcast_to(p_ref[5], state_shape)
    w_hg = jnp.broadcast_to(p_ref[6], state_shape)
    w_ho = jnp.broadcast_to(p_ref[7], state_shape)

    h = jnp.zeros(state_shape, jnp.float32)
    c = jnp.zeros(state_shape, jnp.float32)
    acc = jnp.zeros(state_shape, jnp.float32)

    # T = 6 is tiny and static -> fully unrolled recurrence (VPU + EUP path;
    # 1x1 "matmuls" would waste the MXU, so keep everything elementwise).
    # The x*w_ih + b projections stay inline: VPU-only, they co-issue next to
    # the EUP-bound chain, and no (T,8,Bl) temporaries hit VMEM.
    for t in range(SEQ_LEN):
        xt = x_ref[t]                                   # (8, Bl)
        i_t = _sigmoid(xt * w_ii + b_i + h * w_hi)
        f_t = _sigmoid(xt * w_if + b_f + h * w_hf)
        g_t = jnp.tanh(xt * w_ig + b_g + h * w_hg)
        o_t = _sigmoid(xt * w_io + b_o + h * w_ho)
        c = f_t * c + i_t * g_t
        h = o_t * jnp.tanh(c)
        acc = acc + h * p_ref[16 + t]                   # fused Linear(T*H, 1)

    o_ref[...] = acc + p_ref[22]                        # dense (8, Bl) store


def pack_params(p):
    return jnp.concatenate([
        p["w_ih"].reshape(-1), p["w_hh"].reshape(-1),
        p["b_ih"].reshape(-1), p["b_hh"].reshape(-1),
        p["fc_w"].reshape(-1), p["fc_b"].reshape(-1),
    ]).astype(jnp.float32)


def lstm_net_forward(x, params, *, block_lanes=512):
    """x: (B, T, 1) float32 -> (B, 1) float32.

    Batch many clients / samples along B before calling: one big sublane+lane
    dense pallas_call amortizes the ~0.35 us/step fixed overhead.
    """
    B, T, I = x.shape
    assert T == SEQ_LEN and I == INPUT

    # Block sizing: multiple of 128 lanes; keep >=2 grid steps where the batch
    # allows so the "parallel" axis shards across both v7x TensorCores
    # (no-op on single-TC v5e/v6e).
    block_l = max(128, (block_lanes // 128) * 128)
    while block_l > 128 and pl.cdiv(B, SUBLANES * block_l) < 2:
        block_l = max(128, ((block_l // 2) // 128) * 128)
    n_blocks = pl.cdiv(B, SUBLANES * block_l)
    Bp = n_blocks * SUBLANES * block_l
    Lp = Bp // SUBLANES

    # Relayout: (B, T, 1) -> (T, B) -> pad -> (T, 8, Lp).  The padded batch
    # slots compute on zeros and are discarded by out[:B] below.
    x_tb = jnp.transpose(x.reshape(B, T).astype(jnp.float32))   # (T, B)
    if Bp != B:
        x_tb = jnp.pad(x_tb, ((0, 0), (0, Bp - B)))
    x_sb = x_tb.reshape(SEQ_LEN, SUBLANES, Lp)

    packed = pack_params(params)                                # (23,) -> SMEM

    out = pl.pallas_call(
        lstm_fc_kernel,
        out_shape=jax.ShapeDtypeStruct((SUBLANES, Lp), jnp.float32),
        grid_spec=pltpu.PrefetchScalarGridSpec(
            num_scalar_prefetch=1,
            grid=(n_blocks,),
            in_specs=[pl.BlockSpec((SEQ_LEN, SUBLANES, block_l),
                                   lambda i, p: (0, 0, i))],
            out_specs=pl.BlockSpec((SUBLANES, block_l), lambda i, p: (0, i)),
        ),
        compiler_params=pltpu.CompilerParams(
            dimension_semantics=("parallel",)),   # megacore sharding on v7x
    )(packed, x_sb)

    return out.reshape(Bp)[:B].reshape(B, OUTPUT)


def init_params(key):
    """PyTorch defaults: nn.LSTM params ~ U(-1/sqrt(H), 1/sqrt(H));
       nn.Linear ~ U(-1/sqrt(fan_in), 1/sqrt(fan_in))."""
    k = jax.random.split(key, 6)
    k_lstm = 1.0 / jnp.sqrt(jnp.float32(HIDDEN))           # = 1.0
    k_fc = 1.0 / jnp.sqrt(jnp.float32(SEQ_LEN * HIDDEN))   # = 1/sqrt(6)
    u = lambda kk, shape, lim: jax.random.uniform(
        kk, shape, jnp.float32, minval=-lim, maxval=lim)
    return {
        "w_ih": u(k[0], (4 * HIDDEN * INPUT,), k_lstm),     # (4,)
        "w_hh": u(k[1], (4 * HIDDEN * HIDDEN,), k_lstm),    # (4,)
        "b_ih": u(k[2], (4 * HIDDEN,), k_lstm),             # (4,)
        "b_hh": u(k[3], (4 * HIDDEN,), k_lstm),             # (4,)
        "fc_w": u(k[4], (SEQ_LEN * HIDDEN,), k_fc),         # (6,)
        "fc_b": u(k[5], (OUTPUT,), k_fc),                   # (1,)
    }


def reference_forward(x, p):
    """Pure-JAX reference of the PyTorch LSTMNet forward (batch_first LSTM
       over the sequence, hidden states flattened, then Linear(T*H, 1))."""
    B, T, _ = x.shape
    w_ih = p["w_ih"]; w_hh = p["w_hh"]; b_ih = p["b_ih"]; b_hh = p["b_hh"]
    h = jnp.zeros((B, HIDDEN), jnp.float32)
    c = jnp.zeros((B, HIDDEN), jnp.float32)
    hs = []
    for t in range(T):
        xt = x[:, t, :]
        i_t = jax.nn.sigmoid(xt * w_ih[0] + b_ih[0] + h * w_hh[0] + b_hh[0])
        f_t = jax.nn.sigmoid(xt * w_ih[1] + b_ih[1] + h * w_hh[1] + b_hh[1])
        g_t = jnp.tanh(xt * w_ih[2] + b_ih[2] + h * w_hh[2] + b_hh[2])
        o_t = jax.nn.sigmoid(xt * w_ih[3] + b_ih[3] + h * w_hh[3] + b_hh[3])
        c = f_t * c + i_t * g_t
        h = o_t * jnp.tanh(c)
        hs.append(h)
    hseq = jnp.concatenate(hs, axis=1)                       # (B, T*H)
    return hseq @ p["fc_w"].reshape(SEQ_LEN * HIDDEN, OUTPUT) + p["fc_b"]


if __name__ == "__main__":
    key = jax.random.PRNGKey(0)
    k_param, k_x = jax.random.split(key)
    params = init_params(k_param)

    # "fused clients" batch: non-multiple of the 8x128 block so the padding
    # path is exercised, and 2 grid blocks so the parallel axis has work for
    # both v7x TensorCores (block auto-halves 512 -> 128 lanes here).
    B = 2000
    x = jax.random.normal(k_x, (B, SEQ_LEN, INPUT), jnp.float32)

    y = lstm_net_forward(x, params)
    y = jax.block_until_ready(y)

    y_ref = reference_forward(x, params)
    assert y.shape == (B, OUTPUT)
    assert jnp.allclose(y, y_ref, atol=1e-5, rtol=1e-5)
    print("KERNEL_OK")
</pallas_src>

<mosaic_0001>
module attributes {stable_mosaic.version = 11 : i64} {
  func.func @lstm_fc_kernel(%arg0: i32, %arg1: memref<23xf32, #tpu.memory_space<smem>>, %arg2: memref<6x8x128xf32, #tpu.memory_space<vmem>>, %arg3: memref<8x128xf32, #tpu.memory_space<vmem>>) attributes {dimension_semantics = [#tpu.dimension_semantics<parallel>], iteration_bounds = array<i64: 2>, scalar_prefetch = 1 : i64, scratch_operands = 0 : i64, tpu.core_type = #tpu.core_type<tc>, window_params = [{transform_indices = @transform_0, window_bounds = array<i64: 6, 8, 128>}, {transform_indices = @transform_1, window_bounds = array<i64: 8, 128>}]} {
    %c0 = arith.constant 0 : index
    %0 = memref.load %arg1[%c0] : memref<23xf32, #tpu.memory_space<smem>>
    %c1 = arith.constant 1 : index
    %1 = memref.load %arg1[%c1] : memref<23xf32, #tpu.memory_space<smem>>
    %c2 = arith.constant 2 : index
    %2 = memref.load %arg1[%c2] : memref<23xf32, #tpu.memory_space<smem>>
    %c3 = arith.constant 3 : index
    %3 = memref.load %arg1[%c3] : memref<23xf32, #tpu.memory_space<smem>>
    %c8 = arith.constant 8 : index
    %4 = memref.load %arg1[%c8] : memref<23xf32, #tpu.memory_space<smem>>
    %c12 = arith.constant 12 : index
    %5 = memref.load %arg1[%c12] : memref<23xf32, #tpu.memory_space<smem>>
    %6 = arith.addf %4, %5 : f32
    %c9 = arith.constant 9 : index
    %7 = memref.load %arg1[%c9] : memref<23xf32, #tpu.memory_space<smem>>
    %c13 = arith.constant 13 : index
    %8 = memref.load %arg1[%c13] : memref<23xf32, #tpu.memory_space<smem>>
    %9 = arith.addf %7, %8 : f32
    %c10 = arith.constant 10 : index
    %10 = memref.load %arg1[%c10] : memref<23xf32, #tpu.memory_space<smem>>
    %c14 = arith.constant 14 : index
    %11 = memref.load %arg1[%c14] : memref<23xf32, #tpu.memory_space<smem>>
    %12 = arith.addf %10, %11 : f32
    %c11 = arith.constant 11 : index
    %13 = memref.load %arg1[%c11] : memref<23xf32, #tpu.memory_space<smem>>
    %c15 = arith.constant 15 : index
    %14 = memref.load %arg1[%c15] : memref<23xf32, #tpu.memory_space<smem>>
    %15 = arith.addf %13, %14 : f32
    %c4 = arith.constant 4 : index
    %16 = memref.load %arg1[%c4] : memref<23xf32, #tpu.memory_space<smem>>
    %17 = vector.broadcast %16 : f32 to vector<8x128xf32>
    %c5 = arith.constant 5 : index
    %18 = memref.load %arg1[%c5] : memref<23xf32, #tpu.memory_space<smem>>
    %19 = vector.broadcast %18 : f32 to vector<8x128xf32>
    %c6 = arith.constant 6 : index
    %20 = memref.load %arg1[%c6] : memref<23xf32, #tpu.memory_space<smem>>
    %21 = vector.broadcast %20 : f32 to vector<8x128xf32>
    %c7 = arith.constant 7 : index
    %22 = memref.load %arg1[%c7] : memref<23xf32, #tpu.memory_space<smem>>
    %23 = vector.broadcast %22 : f32 to vector<8x128xf32>
    %cst = arith.constant 0.000000e+00 : f32
    %24 = vector.broadcast %cst : f32 to vector<8x128xf32>
    %cst_0 = arith.constant 0.000000e+00 : f32
    %25 = vector.broadcast %cst_0 : f32 to vector<8x128xf32>
    %cst_1 = arith.constant 0.000000e+00 : f32
    %26 = vector.broadcast %cst_1 : f32 to vector<8x128xf32>
    %c0_2 = arith.constant 0 : index
    %c0_3 = arith.constant 0 : index
    %c0_4 = arith.constant 0 : index
    %27 = vector.load %arg2[%c0_2, %c0_3, %c0_4] : memref<6x8x128xf32, #tpu.memory_space<vmem>>, vector<1x8x128xf32>
    %28 = vector.shape_cast %27 : vector<1x8x128xf32> to vector<8x128xf32>
    %29 = vector.broadcast %0 : f32 to vector<8x128xf32>
    %30 = arith.mulf %28, %29 : vector<8x128xf32>
    %31 = vector.broadcast %6 : f32 to vector<8x128xf32>
    %32 = arith.addf %30, %31 : vector<8x128xf32>
    %33 = arith.mulf %24, %17 : vector<8x128xf32>
    %34 = arith.addf %32, %33 : vector<8x128xf32>
    %cst_5 = arith.constant 5.000000e-01 : f32
    %35 = vector.broadcast %cst_5 : f32 to vector<8x128xf32>
    %36 = arith.mulf %35, %34 : vector<8x128xf32>
    %37 = math.tanh %36 : vector<8x128xf32>
    %cst_6 = arith.constant 5.000000e-01 : f32
    %38 = vector.broadcast %cst_6 : f32 to vector<8x128xf32>
    %39 = arith.mulf %38, %37 : vector<8x128xf32>
    %cst_7 = arith.constant 5.000000e-01 : f32
    %40 = vector.broadcast %cst_7 : f32 to vector<8x128xf32>
    %41 = arith.addf %39, %40 : vector<8x128xf32>
    %42 = vector.broadcast %1 : f32 to vector<8x128xf32>
    %43 = arith.mulf %28, %42 : vector<8x128xf32>
    %44 = vector.broadcast %9 : f32 to vector<8x128xf32>
    %45 = arith.addf %43, %44 : vector<8x128xf32>
    %46 = arith.mulf %24, %19 : vector<8x128xf32>
    %47 = arith.addf %45, %46 : vector<8x128xf32>
    %cst_8 = arith.constant 5.000000e-01 : f32
    %48 = vector.broadcast %cst_8 : f32 to vector<8x128xf32>
    %49 = arith.mulf %48, %47 : vector<8x128xf32>
    %50 = math.tanh %49 : vector<8x128xf32>
    %cst_9 = arith.constant 5.000000e-01 : f32
    %51 = vector.broadcast %cst_9 : f32 to vector<8x128xf32>
    %52 = arith.mulf %51, %50 : vector<8x128xf32>
    %cst_10 = arith.constant 5.000000e-01 : f32
    %53 = vector.broadcast %cst_10 : f32 to vector<8x128xf32>
    %54 = arith.addf %52, %53 : vector<8x128xf32>
    %55 = vector.broadcast %2 : f32 to vector<8x128xf32>
    %56 = arith.mulf %28, %55 : vector<8x128xf32>
    %57 = vector.broadcast %12 : f32 to vector<8x128xf32>
    %58 = arith.addf %56, %57 : vector<8x128xf32>
    %59 = arith.mulf %24, %21 : vector<8x128xf32>
    %60 = arith.addf %58, %59 : vector<8x128xf32>
    %61 = math.tanh %60 : vector<8x128xf32>
    %62 = vector.broadcast %3 : f32 to vector<8x128xf32>
    %63 = arith.mulf %28, %62 : vector<8x128xf32>
    %64 = vector.broadcast %15 : f32 to vector<8x128xf32>
    %65 = arith.addf %63, %64 : vector<8x128xf32>
    %66 = arith.mulf %24, %23 : vector<8x128xf32>
    %67 = arith.addf %65, %66 : vector<8x128xf32>
    %cst_11 = arith.constant 5.000000e-01 : f32
    %68 = vector.broadcast %cst_11 : f32 to vector<8x128xf32>
    %69 = arith.mulf %68, %67 : vector<8x128xf32>
    %70 = math.tanh %69 : vector<8x128xf32>
    %cst_12 = arith.constant 5.000000e-01 : f32
    %71 = vector.broadcast %cst_12 : f32 to vector<8x128xf32>
    %72 = arith.mulf %71, %70 : vector<8x128xf32>
    %cst_13 = arith.constant 5.000000e-01 : f32
    %73 = vector.broadcast %cst_13 : f32 to vector<8x128xf32>
    %74 = arith.addf %72, %73 : vector<8x128xf32>
    %75 = arith.mulf %54, %25 : vector<8x128xf32>
    %76 = arith.mulf %41, %61 : vector<8x128xf32>
    %77 = arith.addf %75, %76 : vector<8x128xf32>
    %78 = math.tanh %77 : vector<8x128xf32>
    %79 = arith.mulf %74, %78 : vector<8x128xf32>
    %c16 = arith.constant 16 : index
    %80 = memref.load %arg1[%c16] : memref<23xf32, #tpu.memory_space<smem>>
    %81 = vector.broadcast %80 : f32 to vector<8x128xf32>
    %82 = arith.mulf %79, %81 : vector<8x128xf32>
    %83 = arith.addf %26, %82 : vector<8x128xf32>
    %c1_14 = arith.constant 1 : index
    %c0_15 = arith.constant 0 : index
    %c0_16 = arith.constant 0 : index
    %84 = vector.load %arg2[%c1_14, %c0_15, %c0_16] : memref<6x8x128xf32, #tpu.memory_space<vmem>>, vector<1x8x128xf32>
    %85 = vector.shape_cast %84 : vector<1x8x128xf32> to vector<8x128xf32>
    %86 = vector.broadcast %0 : f32 to vector<8x128xf32>
    %87 = arith.mulf %85, %86 : vector<8x128xf32>
    %88 = vector.broadcast %6 : f32 to vector<8x128xf32>
    %89 = arith.addf %87, %88 : vector<8x128xf32>
    %90 = arith.mulf %79, %17 : vector<8x128xf32>
    %91 = arith.addf %89, %90 : vector<8x128xf32>
    %cst_17 = arith.constant 5.000000e-01 : f32
    %92 = vector.broadcast %cst_17 : f32 to vector<8x128xf32>
    %93 = arith.mulf %92, %91 : vector<8x128xf32>
    %94 = math.tanh %93 : vector<8x128xf32>
    %cst_18 = arith.constant 5.000000e-01 : f32
    %95 = vector.broadcast %cst_18 : f32 to vector<8x128xf32>
    %96 = arith.mulf %95, %94 : vector<8x128xf32>
    %cst_19 = arith.constant 5.000000e-01 : f32
    %97 = vector.broadcast %cst_19 : f32 to vector<8x128xf32>
    %98 = arith.addf %96, %97 : vector<8x128xf32>
    %99 = vector.broadcast %1 : f32 to vector<8x128xf32>
    %100 = arith.mulf %85, %99 : vector<8x128xf32>
    %101 = vector.broadcast %9 : f32 to vector<8x128xf32>
    %102 = arith.addf %100, %101 : vector<8x128xf32>
    %103 = arith.mulf %79, %19 : vector<8x128xf32>
    %104 = arith.addf %102, %103 : vector<8x128xf32>
    %cst_20 = arith.constant 5.000000e-01 : f32
    %105 = vector.broadcast %cst_20 : f32 to vector<8x128xf32>
    %106 = arith.mulf %105, %104 : vector<8x128xf32>
    %107 = math.tanh %106 : vector<8x128xf32>
    %cst_21 = arith.constant 5.000000e-01 : f32
    %108 = vector.broadcast %cst_21 : f32 to vector<8x128xf32>
    %109 = arith.mulf %108, %107 : vector<8x128xf32>
    %cst_22 = arith.constant 5.000000e-01 : f32
    %110 = vector.broadcast %cst_22 : f32 to vector<8x128xf32>
    %111 = arith.addf %109, %110 : vector<8x128xf32>
    %112 = vector.broadcast %2 : f32 to vector<8x128xf32>
    %113 = arith.mulf %85, %112 : vector<8x128xf32>
    %114 = vector.broadcast %12 : f32 to vector<8x128xf32>
    %115 = arith.addf %113, %114 : vector<8x128xf32>
    %116 = arith.mulf %79, %21 : vector<8x128xf32>
    %117 = arith.addf %115, %116 : vector<8x128xf32>
    %118 = math.tanh %117 : vector<8x128xf32>
    %119 = vector.broadcast %3 : f32 to vector<8x128xf32>
    %120 = arith.mulf %85, %119 : vector<8x128xf32>
    %121 = vector.broadcast %15 : f32 to vector<8x128xf32>
    %122 = arith.addf %120, %121 : vector<8x128xf32>
    %123 = arith.mulf %79, %23 : vector<8x128xf32>
    %124 = arith.addf %122, %123 : vector<8x128xf32>
    %cst_23 = arith.constant 5.000000e-01 : f32
    %125 = vector.broadcast %cst_23 : f32 to vector<8x128xf32>
    %126 = arith.mulf %125, %124 : vector<8x128xf32>
    %127 = math.tanh %126 : vector<8x128xf32>
    %cst_24 = arith.constant 5.000000e-01 : f32
    %128 = vector.broadcast %cst_24 : f32 to vector<8x128xf32>
    %129 = arith.mulf %128, %127 : vector<8x128xf32>
    %cst_25 = arith.constant 5.000000e-01 : f32
    %130 = vector.broadcast %cst_25 : f32 to vector<8x128xf32>
    %131 = arith.addf %129, %130 : vector<8x128xf32>
    %132 = arith.mulf %111, %77 : vector<8x128xf32>
    %133 = arith.mulf %98, %118 : vector<8x128xf32>
    %134 = arith.addf %132, %133 : vector<8x128xf32>
    %135 = math.tanh %134 : vector<8x128xf32>
    %136 = arith.mulf %131, %135 : vector<8x128xf32>
    %c17 = arith.constant 17 : index
    %137 = memref.load %arg1[%c17] : memref<23xf32, #tpu.memory_space<smem>>
    %138 = vector.broadcast %137 : f32 to vector<8x128xf32>
    %139 = arith.mulf %136, %138 : vector<8x128xf32>
    %140 = arith.addf %83, %139 : vector<8x128xf32>
    %c2_26 = arith.constant 2 : index
    %c0_27 = arith.constant 0 : index
    %c0_28 = arith.constant 0 : index
    %141 = vector.load %arg2[%c2_26, %c0_27, %c0_28] : memref<6x8x128xf32, #tpu.memory_space<vmem>>, vector<1x8x128xf32>
    %142 = vector.shape_cast %141 : vector<1x8x128xf32> to vector<8x128xf32>
    %143 = vector.broadcast %0 : f32 to vector<8x128xf32>
    %144 = arith.mulf %142, %143 : vector<8x128xf32>
    %145 = vector.broadcast %6 : f32 to vector<8x128xf32>
    %146 = arith.addf %144, %145 : vector<8x128xf32>
    %147 = arith.mulf %136, %17 : vector<8x128xf32>
    %148 = arith.addf %146, %147 : vector<8x128xf32>
    %cst_29 = arith.constant 5.000000e-01 : f32
    %149 = vector.broadcast %cst_29 : f32 to vector<8x128xf32>
    %150 = arith.mulf %149, %148 : vector<8x128xf32>
    %151 = math.tanh %150 : vector<8x128xf32>
    %cst_30 = arith.constant 5.000000e-01 : f32
    %152 = vector.broadcast %cst_30 : f32 to vector<8x128xf32>
    %153 = arith.mulf %152, %151 : vector<8x128xf32>
    %cst_31 = arith.constant 5.000000e-01 : f32
    %154 = vector.broadcast %cst_31 : f32 to vector<8x128xf32>
    %155 = arith.addf %153, %154 : vector<8x128xf32>
    %156 = vector.broadcast %1 : f32 to vector<8x128xf32>
    %157 = arith.mulf %142, %156 : vector<8x128xf32>
    %158 = vector.broadcast %9 : f32 to vector<8x128xf32>
    %159 = arith.addf %157, %158 : vector<8x128xf32>
    %160 = arith.mulf %136, %19 : vector<8x128xf32>
    %161 = arith.addf %159, %160 : vector<8x128xf32>
    %cst_32 = arith.constant 5.000000e-01 : f32
    %162 = vector.broadcast %cst_32 : f32 to vector<8x128xf32>
    %163 = arith.mulf %162, %161 : vector<8x128xf32>
    %164 = math.tanh %163 : vector<8x128xf32>
    %cst_33 = arith.constant 5.000000e-01 : f32
    %165 = vector.broadcast %cst_33 : f32 to vector<8x128xf32>
    %166 = arith.mulf %165, %164 : vector<8x128xf32>
    %cst_34 = arith.constant 5.000000e-01 : f32
    %167 = vector.broadcast %cst_34 : f32 to vector<8x128xf32>
    %168 = arith.addf %166, %167 : vector<8x128xf32>
    %169 = vector.broadcast %2 : f32 to vector<8x128xf32>
    %170 = arith.mulf %142, %169 : vector<8x128xf32>
    %171 = vector.broadcast %12 : f32 to vector<8x128xf32>
    %172 = arith.addf %170, %171 : vector<8x128xf32>
    %173 = arith.mulf %136, %21 : vector<8x128xf32>
    %174 = arith.addf %172, %173 : vector<8x128xf32>
    %175 = math.tanh %174 : vector<8x128xf32>
    %176 = vector.broadcast %3 : f32 to vector<8x128xf32>
    %177 = arith.mulf %142, %176 : vector<8x128xf32>
    %178 = vector.broadcast %15 : f32 to vector<8x128xf32>
    %179 = arith.addf %177, %178 : vector<8x128xf32>
    %180 = arith.mulf %136, %23 : vector<8x128xf32>
    %181 = arith.addf %179, %180 : vector<8x128xf32>
    %cst_35 = arith.constant 5.000000e-01 : f32
    %182 = vector.broadcast %cst_35 : f32 to vector<8x128xf32>
    %183 = arith.mulf %182, %181 : vector<8x128xf32>
    %184 = math.tanh %183 : vector<8x128xf32>
    %cst_36 = arith.constant 5.000000e-01 : f32
    %185 = vector.broadcast %cst_36 : f32 to vector<8x128xf32>
    %186 = arith.mulf %185, %184 : vector<8x128xf32>
    %cst_37 = arith.constant 5.000000e-01 : f32
    %187 = vector.broadcast %cst_37 : f32 to vector<8x128xf32>
    %188 = arith.addf %186, %187 : vector<8x128xf32>
    %189 = arith.mulf %168, %134 : vector<8x128xf32>
    %190 = arith.mulf %155, %175 : vector<8x128xf32>
    %191 = arith.addf %189, %190 : vector<8x128xf32>
    %192 = math.tanh %191 : vector<8x128xf32>
    %193 = arith.mulf %188, %192 : vector<8x128xf32>
    %c18 = arith.constant 18 : index
    %194 = memref.load %arg1[%c18] : memref<23xf32, #tpu.memory_space<smem>>
    %195 = vector.broadcast %194 : f32 to vector<8x128xf32>
    %196 = arith.mulf %193, %195 : vector<8x128xf32>
    %197 = arith.addf %140, %196 : vector<8x128xf32>
    %c3_38 = arith.constant 3 : index
    %c0_39 = arith.constant 0 : index
    %c0_40 = arith.constant 0 : index
    %198 = vector.load %arg2[%c3_38, %c0_39, %c0_40] : memref<6x8x128xf32, #tpu.memory_space<vmem>>, vector<1x8x128xf32>
    %199 = vector.shape_cast %198 : vector<1x8x128xf32> to vector<8x128xf32>
    %200 = vector.broadcast %0 : f32 to vector<8x128xf32>
    %201 = arith.mulf %199, %200 : vector<8x128xf32>
    %202 = vector.broadcast %6 : f32 to vector<8x128xf32>
    %203 = arith.addf %201, %202 : vector<8x128xf32>
    %204 = arith.mulf %193, %17 : vector<8x128xf32>
    %205 = arith.addf %203, %204 : vector<8x128xf32>
    %cst_41 = arith.constant 5.000000e-01 : f32
    %206 = vector.broadcast %cst_41 : f32 to vector<8x128xf32>
    %207 = arith.mulf %206, %205 : vector<8x128xf32>
    %208 = math.tanh %207 : vector<8x128xf32>
    %cst_42 = arith.constant 5.000000e-01 : f32
    %209 = vector.broadcast %cst_42 : f32 to vector<8x128xf32>
    %210 = arith.mulf %209, %208 : vector<8x128xf32>
    %cst_43 = arith.constant 5.000000e-01 : f32
    %211 = vector.broadcast %cst_43 : f32 to vector<8x128xf32>
    %212 = arith.addf %210, %211 : vector<8x128xf32>
    %213 = vector.broadcast %1 : f32 to vector<8x128xf32>
    %214 = arith.mulf %199, %213 : vector<8x128xf32>
    %215 = vector.broadcast %9 : f32 to vector<8x128xf32>
    %216 = arith.addf %214, %215 : vector<8x128xf32>
    %217 = arith.mulf %193, %19 : vector<8x128xf32>
    %218 = arith.addf %216, %217 : vector<8x128xf32>
    %cst_44 = arith.constant 5.000000e-01 : f32
    %219 = vector.broadcast %cst_44 : f32 to vector<8x128xf32>
    %220 = arith.mulf %219, %218 : vector<8x128xf32>
    %221 = math.tanh %220 : vector<8x128xf32>
    %cst_45 = arith.constant 5.000000e-01 : f32
    %222 = vector.broadcast %cst_45 : f32 to vector<8x128xf32>
    %223 = arith.mulf %222, %221 : vector<8x128xf32>
    %cst_46 = arith.constant 5.000000e-01 : f32
    %224 = vector.broadcast %cst_46 : f32 to vector<8x128xf32>
    %225 = arith.addf %223, %224 : vector<8x128xf32>
    %226 = vector.broadcast %2 : f32 to vector<8x128xf32>
    %227 = arith.mulf %199, %226 : vector<8x128xf32>
    %228 = vector.broadcast %12 : f32 to vector<8x128xf32>
    %229 = arith.addf %227, %228 : vector<8x128xf32>
    %230 = arith.mulf %193, %21 : vector<8x128xf32>
    %231 = arith.addf %229, %230 : vector<8x128xf32>
    %232 = math.tanh %231 : vector<8x128xf32>
    %233 = vector.broadcast %3 : f32 to vector<8x128xf32>
    %234 = arith.mulf %199, %233 : vector<8x128xf32>
    %235 = vector.broadcast %15 : f32 to vector<8x128xf32>
    %236 = arith.addf %234, %235 : vector<8x128xf32>
    %237 = arith.mulf %193, %23 : vector<8x128xf32>
    %238 = arith.addf %236, %237 : vector<8x128xf32>
    %cst_47 = arith.constant 5.000000e-01 : f32
    %239 = vector.broadcast %cst_47 : f32 to vector<8x128xf32>
    %240 = arith.mulf %239, %238 : vector<8x128xf32>
    %241 = math.tanh %240 : vector<8x128xf32>
    %cst_48 = arith.constant 5.000000e-01 : f32
    %242 = vector.broadcast %cst_48 : f32 to vector<8x128xf32>
    %243 = arith.mulf %242, %241 : vector<8x128xf32>
    %cst_49 = arith.constant 5.000000e-01 : f32
    %244 = vector.broadcast %cst_49 : f32 to vector<8x128xf32>
    %245 = arith.addf %243, %244 : vector<8x128xf32>
    %246 = arith.mulf %225, %191 : vector<8x128xf32>
    %247 = arith.mulf %212, %232 : vector<8x128xf32>
    %248 = arith.addf %246, %247 : vector<8x128xf32>
    %249 = math.tanh %248 : vector<8x128xf32>
    %250 = arith.mulf %245, %249 : vector<8x128xf32>
    %c19 = arith.constant 19 : index
    %251 = memref.load %arg1[%c19] : memref<23xf32, #tpu.memory_space<smem>>
    %252 = vector.broadcast %251 : f32 to vector<8x128xf32>
    %253 = arith.mulf %250, %252 : vector<8x128xf32>
    %254 = arith.addf %197, %253 : vector<8x128xf32>
    %c4_50 = arith.constant 4 : index
    %c0_51 = arith.constant 0 : index
    %c0_52 = arith.constant 0 : index
    %255 = vector.load %arg2[%c4_50, %c0_51, %c0_52] : memref<6x8x128xf32, #tpu.memory_space<vmem>>, vector<1x8x128xf32>
    %256 = vector.shape_cast %255 : vector<1x8x128xf32> to vector<8x128xf32>
    %257 = vector.broadcast %0 : f32 to vector<8x128xf32>
    %258 = arith.mulf %256, %257 : vector<8x128xf32>
    %259 = vector.broadcast %6 : f32 to vector<8x128xf32>
    %260 = arith.addf %258, %259 : vector<8x128xf32>
    %261 = arith.mulf %250, %17 : vector<8x128xf32>
    %262 = arith.addf %260, %261 : vector<8x128xf32>
    %cst_53 = arith.constant 5.000000e-01 : f32
    %263 = vector.broadcast %cst_53 : f32 to vector<8x128xf32>
    %264 = arith.mulf %263, %262 : vector<8x128xf32>
    %265 = math.tanh %264 : vector<8x128xf32>
    %cst_54 = arith.constant 5.000000e-01 : f32
    %266 = vector.broadcast %cst_54 : f32 to vector<8x128xf32>
    %267 = arith.mulf %266, %265 : vector<8x128xf32>
    %cst_55 = arith.constant 5.000000e-01 : f32
    %268 = vector.broadcast %cst_55 : f32 to vector<8x128xf32>
    %269 = arith.addf %267, %268 : vector<8x128xf32>
    %270 = vector.broadcast %1 : f32 to vector<8x128xf32>
    %271 = arith.mulf %256, %270 : vector<8x128xf32>
    %272 = vector.broadcast %9 : f32 to vector<8x128xf32>
    %273 = arith.addf %271, %272 : vector<8x128xf32>
    %274 = arith.mulf %250, %19 : vector<8x128xf32>
    %275 = arith.addf %273, %274 : vector<8x128xf32>
    %cst_56 = arith.constant 5.000000e-01 : f32
    %276 = vector.broadcast %cst_56 : f32 to vector<8x128xf32>
    %277 = arith.mulf %276, %275 : vector<8x128xf32>
    %278 = math.tanh %277 : vector<8x128xf32>
    %cst_57 = arith.constant 5.000000e-01 : f32
    %279 = vector.broadcast %cst_57 : f32 to vector<8x128xf32>
    %280 = arith.mulf %279, %278 : vector<8x128xf32>
    %cst_58 = arith.constant 5.000000e-01 : f32
    %281 = vector.broadcast %cst_58 : f32 to vector<8x128xf32>
    %282 = arith.addf %280, %281 : vector<8x128xf32>
    %283 = vector.broadcast %2 : f32 to vector<8x128xf32>
    %284 = arith.mulf %256, %283 : vector<8x128xf32>
    %285 = vector.broadcast %12 : f32 to vector<8x128xf32>
    %286 = arith.addf %284, %285 : vector<8x128xf32>
    %287 = arith.mulf %250, %21 : vector<8x128xf32>
    %288 = arith.addf %286, %287 : vector<8x128xf32>
    %289 = math.tanh %288 : vector<8x128xf32>
    %290 = vector.broadcast %3 : f32 to vector<8x128xf32>
    %291 = arith.mulf %256, %290 : vector<8x128xf32>
    %292 = vector.broadcast %15 : f32 to vector<8x128xf32>
    %293 = arith.addf %291, %292 : vector<8x128xf32>
    %294 = arith.mulf %250, %23 : vector<8x128xf32>
    %295 = arith.addf %293, %294 : vector<8x128xf32>
    %cst_59 = arith.constant 5.000000e-01 : f32
    %296 = vector.broadcast %cst_59 : f32 to vector<8x128xf32>
    %297 = arith.mulf %296, %295 : vector<8x128xf32>
    %298 = math.tanh %297 : vector<8x128xf32>
    %cst_60 = arith.constant 5.000000e-01 : f32
    %299 = vector.broadcast %cst_60 : f32 to vector<8x128xf32>
    %300 = arith.mulf %299, %298 : vector<8x128xf32>
    %cst_61 = arith.constant 5.000000e-01 : f32
    %301 = vector.broadcast %cst_61 : f32 to vector<8x128xf32>
    %302 = arith.addf %300, %301 : vector<8x128xf32>
    %303 = arith.mulf %282, %248 : vector<8x128xf32>
    %304 = arith.mulf %269, %289 : vector<8x128xf32>
    %305 = arith.addf %303, %304 : vector<8x128xf32>
    %306 = math.tanh %305 : vector<8x128xf32>
    %307 = arith.mulf %302, %306 : vector<8x128xf32>
    %c20 = arith.constant 20 : index
    %308 = memref.load %arg1[%c20] : memref<23xf32, #tpu.memory_space<smem>>
    %309 = vector.broadcast %308 : f32 to vector<8x128xf32>
    %310 = arith.mulf %307, %309 : vector<8x128xf32>
    %311 = arith.addf %254, %310 : vector<8x128xf32>
    %c5_62 = arith.constant 5 : index
    %c0_63 = arith.constant 0 : index
    %c0_64 = arith.constant 0 : index
    %312 = vector.load %arg2[%c5_62, %c0_63, %c0_64] : memref<6x8x128xf32, #tpu.memory_space<vmem>>, vector<1x8x128xf32>
    %313 = vector.shape_cast %312 : vector<1x8x128xf32> to vector<8x128xf32>
    %314 = vector.broadcast %0 : f32 to vector<8x128xf32>
    %315 = arith.mulf %313, %314 : vector<8x128xf32>
    %316 = vector.broadcast %6 : f32 to vector<8x128xf32>
    %317 = arith.addf %315, %316 : vector<8x128xf32>
    %318 = arith.mulf %307, %17 : vector<8x128xf32>
    %319 = arith.addf %317, %318 : vector<8x128xf32>
    %cst_65 = arith.constant 5.000000e-01 : f32
    %320 = vector.broadcast %cst_65 : f32 to vector<8x128xf32>
    %321 = arith.mulf %320, %319 : vector<8x128xf32>
    %322 = math.tanh %321 : vector<8x128xf32>
    %cst_66 = arith.constant 5.000000e-01 : f32
    %323 = vector.broadcast %cst_66 : f32 to vector<8x128xf32>
    %324 = arith.mulf %323, %322 : vector<8x128xf32>
    %cst_67 = arith.constant 5.000000e-01 : f32
    %325 = vector.broadcast %cst_67 : f32 to vector<8x128xf32>
    %326 = arith.addf %324, %325 : vector<8x128xf32>
    %327 = vector.broadcast %1 : f32 to vector<8x128xf32>
    %328 = arith.mulf %313, %327 : vector<8x128xf32>
    %329 = vector.broadcast %9 : f32 to vector<8x128xf32>
    %330 = arith.addf %328, %329 : vector<8x128xf32>
    %331 = arith.mulf %307, %19 : vector<8x128xf32>
    %332 = arith.addf %330, %331 : vector<8x128xf32>
    %cst_68 = arith.constant 5.000000e-01 : f32
    %333 = vector.broadcast %cst_68 : f32 to vector<8x128xf32>
    %334 = arith.mulf %333, %332 : vector<8x128xf32>
    %335 = math.tanh %334 : vector<8x128xf32>
    %cst_69 = arith.constant 5.000000e-01 : f32
    %336 = vector.broadcast %cst_69 : f32 to vector<8x128xf32>
    %337 = arith.mulf %336, %335 : vector<8x128xf32>
    %cst_70 = arith.constant 5.000000e-01 : f32
    %338 = vector.broadcast %cst_70 : f32 to vector<8x128xf32>
    %339 = arith.addf %337, %338 : vector<8x128xf32>
    %340 = vector.broadcast %2 : f32 to vector<8x128xf32>
    %341 = arith.mulf %313, %340 : vector<8x128xf32>
    %342 = vector.broadcast %12 : f32 to vector<8x128xf32>
    %343 = arith.addf %341, %342 : vector<8x128xf32>
    %344 = arith.mulf %307, %21 : vector<8x128xf32>
    %345 = arith.addf %343, %344 : vector<8x128xf32>
    %346 = math.tanh %345 : vector<8x128xf32>
    %347 = vector.broadcast %3 : f32 to vector<8x128xf32>
    %348 = arith.mulf %313, %347 : vector<8x128xf32>
    %349 = vector.broadcast %15 : f32 to vector<8x128xf32>
    %350 = arith.addf %348, %349 : vector<8x128xf32>
    %351 = arith.mulf %307, %23 : vector<8x128xf32>
    %352 = arith.addf %350, %351 : vector<8x128xf32>
    %cst_71 = arith.constant 5.000000e-01 : f32
    %353 = vector.broadcast %cst_71 : f32 to vector<8x128xf32>
    %354 = arith.mulf %353, %352 : vector<8x128xf32>
    %355 = math.tanh %354 : vector<8x128xf32>
    %cst_72 = arith.constant 5.000000e-01 : f32
    %356 = vector.broadcast %cst_72 : f32 to vector<8x128xf32>
    %357 = arith.mulf %356, %355 : vector<8x128xf32>
    %cst_73 = arith.constant 5.000000e-01 : f32
    %358 = vector.broadcast %cst_73 : f32 to vector<8x128xf32>
    %359 = arith.addf %357, %358 : vector<8x128xf32>
    %360 = arith.mulf %339, %305 : vector<8x128xf32>
    %361 = arith.mulf %326, %346 : vector<8x128xf32>
    %362 = arith.addf %360, %361 : vector<8x128xf32>
    %363 = math.tanh %362 : vector<8x128xf32>
    %364 = arith.mulf %359, %363 : vector<8x128xf32>
    %c21 = arith.constant 21 : index
    %365 = memref.load %arg1[%c21] : memref<23xf32, #tpu.memory_space<smem>>
    %366 = vector.broadcast %365 : f32 to vector<8x128xf32>
    %367 = arith.mulf %364, %366 : vector<8x128xf32>
    %368 = arith.addf %311, %367 : vector<8x128xf32>
    %c22 = arith.constant 22 : index
    %369 = memref.load %arg1[%c22] : memref<23xf32, #tpu.memory_space<smem>>
    %370 = vector.broadcast %369 : f32 to vector<8x128xf32>
    %371 = arith.addf %368, %370 : vector<8x128xf32>
    %c0_74 = arith.constant 0 : index
    %c0_75 = arith.constant 0 : index
    %372 = vector.load %arg3[%c0_74, %c0_75] : memref<8x128xf32, #tpu.memory_space<vmem>>, vector<8x128xf32>
    tpu.vector_store %arg3[%c0_74, %c0_75], %371 {strides = array<i32>} : memref<8x128xf32, #tpu.memory_space<vmem>>, vector<8x128xf32>,
    return
  }
  func.func @transform_0(%arg0: i32, %arg1: memref<23xf32, #tpu.memory_space<smem>>) -> (i32, i32, i32) {
    %c0_i32 = arith.constant 0 : i32
    %c0_i32_0 = arith.constant 0 : i32
    %c0_i32_1 = arith.constant 0 : i32
    return %c0_i32, %c0_i32_0, %arg0 : i32, i32, i32
  }
  func.func @transform_1(%arg0: i32, %arg1: memref<23xf32, #tpu.memory_space<smem>>) -> (i32, i32) {
    %c0_i32 = arith.constant 0 : i32
    %c0_i32_0 = arith.constant 0 : i32
    return %c0_i32, %arg0 : i32, i32
  }
}

</mosaic_0001>

<bundles_post_ra>
// kernel: tpu_custom_call.1
= control target key start
LH: loop header
LB: loop body
LE: loop exit
PB: predicated region body
PF: predicated region fallthrough
CT: control target
= control target key end

     0   :  { %s751_s9 = smov [#allocation3]   ;;  %s1028_s0 = inlined_call_operand.hbm [shape: f32[23], index: 0, kind: input, shape index: {}]   ;;  %s1029_s1 = inlined_call_operand.hbm [shape: f32[6,8,256], index: 1, kind: input, shape index: {}]   ;;  %s1030_s2 = inlined_call_operand.hbm [shape: f32[8,256], index: 2, kind: output, shape index: {}]  }
   0x1   :  { %8 = dma.hbm_to_smem %s1028_s0, 16, %s751_s9, [#allocation2] }
   0x2   :  { %725 = dma.done.wait [#allocation2], 16 }
   0x3   :  { %726 = vsyncadd [#allocation2], 4294967280 }
   0x4   :  { %10 = sfence }
   0x5   :  { %11 = vsyncpa [#allocation5], 0 }
   0x6   :  { %13 = vsyncpa [#allocation5 + $0x1], 0 }
   0x7   :  { %14 = vsyncpa [#allocation6], 0 }
   0x8   :  { %16 = vsyncpa [#allocation6 + $0x1], 0  ;;  %s775_s12 = smov 0   ;;  %s777_s13 = smov 0  }
   0x9   :  { %s779_s14 = smov 0   ;;  %s781_s15 = smov 0  }
   0xa LB: > { %s796_s0 = sadd.s32 4294967295, %s749_s15   ;;  %s498_s16 = sadd.s32 4294967294, %s749_s15   ;;  %s749_s15 = sphi %s781_s15, %s1045_s15   ;;  %s745_s14 = sphi %s779_s14, %s1044_s14   ;;  %s741_s13 = sphi %s777_s13, %s1043_s13   ;;  %s737_s12 = sphi %s775_s12, %s1042_s12  }
   0xb   : > { %s800_s17 = sadd.s32 1, %s749_s15   ;;  %s29_s18 = sadd.s32 1, %s745_s14 }
   0xc   : > { %s26_s19 = ssub.s32 %s749_s15, %s800_s17  ;;  %p36_p0 = scmp.ne.s32.totalorder %s745_s14, %s741_s13 }
   0xd   : > { %p27_p1 = scmp.eq.s32.totalorder %s26_s19, 0  ;;  %p37_p2 = scmp.eq.s32.totalorder %s749_s15, 0 }
   0xe   : > { %p42_p3 = scmp.ne.s32.totalorder %s741_s13, %s737_s12  ;;  %p43_p4 = scmp.eq.s32.totalorder %s796_s0, 0 }
   0xf   : > { %s812_s20 = scalar_select %p27_p1, %s745_s14, %s29_s18  }
  0x10   : > { %p38_p5 = por %p37_p2, %p36_p0  ;;  %p814_p6 = por %p43_p4, %p42_p3 }
  0x11   : > { %p66_p7 = scmp.eq.s32.totalorder %s796_s0, 1  ;;  %p72_p8 = scmp.eq.s32.totalorder %s498_s16, 1 }
  0x12   : > { %s1033_s21 = scalar_select %p814_p6, 1, 0 }
  0x13   : > { %p549_p10 = scmp.lt.s32.totalorder %s749_s15, 2  ;;  %p821_p11 = por %p66_p7, %p36_p0 }
  0x14   : > { %p825_p12 = por %p72_p8, %p42_p3  ;;  %s92_s24 = sand.u32 1, %s745_s14  }
  0x15   : > { %s1034_s22 = scalar_select %p821_p11, 1, 0 }
  0x16   : > { %s1035_s23 = scalar_select %p825_p12, 1, 0 }
  0x17   : > { %s501_s25 = sshll.u32 %s749_s15, 7  ;;  %s535_s26 = smul.u32 48, %s92_s24 }
  0x18   : > { %s834_s29 = scalar_lea.hbm %s1029_s1, %s501_s25  ;;  %p836_p13 = pnand %p549_p10, %p38_p5 }
  0x19   : > { %s96_s3 = scalar_lea.vmem [#allocation4], %s535_s26  ;;  %s843_s5 = scalar_lea.sflag [#allocation5], %s92_s24 }
  0x1a   : > { %s102_s4 = sshll.u32 %s96_s3, 4  ;;  %s655_s6 = scalar_lea.hbm %s834_s29, 768  ;;  %s840_s4 = int_to_ptr.vmem [resolvable:$true] %s102_s4 }
  0x1b   : > { %p656_p1 = scmp.ne.s32.totalorder %s834_s29, %s655_s6  ;;  %p657_p2 = pneg %p836_p13 }
  0x1c   : > { %s660_s9 = scalar_lea.hbm %s1029_s1, 1536  ;;  %p661_p5 = scmp.lt.s32.totalorder %s834_s29, %s1029_s1 }
  0x1d   : > { %p658_p3 = pnand %p657_p2, %p656_p1  ;;  %p662_p7 = scmp.lt.s32.totalorder %s660_s9, %s655_s6 }
  0x1f   : > { %p659_p4 = pneg %p658_p3  ;;  %p663_p8 = por %p662_p7, %p661_p5 }
  0x21   : > { %p664_p10 = pnand %p663_p8, %p659_p4 }
  0x23   : > { %667 = shalt.err (!%p664_p10)
}
  0x24   : > { %s668_s16 = scalar_lea.vmem %s840_s4, 768  ;;  %s752_s18 = smov [#allocation4]  }
  0x25   : > { %p669_p9 = scmp.ne.s32.totalorder %s840_s4, %s668_s16  ;;  %s673_s19 = sshll.u32 %s752_s18, 4  ;;  %s674_s19 = int_to_ptr.vmem [resolvable:$false] %s673_s19 }
  0x26   : > { %s675_s24 = scalar_lea.vmem %s674_s19, 1536  ;;  %p676_p3 = scmp.lt.s32.totalorder %s840_s4, %s674_s19 }
  0x27   : > { %p671_p0 = pnand %p669_p9, %p657_p2  ;;  %p677_p12 = scmp.lt.s32.totalorder %s675_s24, %s668_s16 }
  0x29   : > { %p672_p1 = pneg %p671_p0  ;;  %p678_p11 = por %p677_p12, %p676_p3 }
  0x2b   : > { %p679_p6 = pnand %p678_p11, %p672_p1 }
  0x2d   : > { %682 = shalt.err (!%p679_p6)
}
  0x2e   : > { %s753_s25 = smov 256   ;;  %s754_s26 = smov 128  }
  0x2f   : > { %s755_s27 = smov 8   ;;  %p110_p9 = scmp.lt.s32.totalorder %s749_s15, 3 }
  0x30   : > { %544 = dma.hbm_to_vmem [thread:$0]  (!%p836_p13), %s834_s29, 768, %s840_s4, %s843_s5, %s753_s25, %s754_s26, %s755_s27  }
  0x31   : > { %p1037_p0 = scmp.ge.s32.totalorder %s749_s15, 1 }
  0x33   : > { %p111_p2 = pnand %p1037_p0, %p110_p9 }
  0x34   : > { %s868_s28 = sand.u32 (!%p111_p2), 1, %s741_s13   ;;  %p1038_p6 = scmp.ne.s32.totalorder (!%p111_p2), %s1033_s21, 0 }
  0x35   : > { %114 = sbr.rel (%p111_p2) target bundleno = 370 (0x172), region = 24  ;;  %s117_s6 = scalar_lea.sflag (!%p111_p2), [#allocation5], %s868_s28 }
  0x36   : > { %s536_s3 = smul.u32 (!%p111_p2), 48, %s868_s28 }
  0x38   : > { %s872_s7 = scalar_lea.vmem (!%p111_p2), [#allocation4], %s536_s3 }
  0x3a   : > { %728 = dma.done.wait (%p1038_p6), %s117_s6, 768  }
  0x3b   : > { %730 = vsyncadd (%p1038_p6), %s117_s6, 4294966528  ;;  %s139_s29 = sld [smem:[#allocation3]]  ;;  %v163_v0 = vld [vmem:[%s872_s7] sm:$0xff]  ;;  %v520_v44 = vld [vmem:[%s872_s7 + $0x8] sm:$0xff]  ;;  %p1039_p12 = scmp.ne.s32.totalorder %s1034_s22, 0 }
  0x3c   : > { %s504_s30 = sld [smem:[#allocation3 + $0x1]] }
  0x3d   : > { %s505_s4 = sld [smem:[#allocation3 + $0x2]] }
  0x3e   : > { %s878_s5 = sld [smem:[#allocation3 + $0x3]] }
  0x3f   : > { %s507_s8 = sld [smem:[#allocation3 + $0x8]] }
  0x40   : > { %s508_s9 = sld [smem:[#allocation3 + $0xc]] }
  0x41   : > { %s509_s10 = sld [smem:[#allocation3 + $0x9]]  ;;  %v885_v1 = vstv %s139_s29 }
  0x42   : > { %s510_s11 = sld [smem:[#allocation3 + $0xd]]  ;;  %v887_v2 = vstv %s504_s30  ;;  %v165_v3 = vmul.f32 %v885_v1, %v163_v0  ;;  %v212_v46 = vmul.f32 %v520_v44, %v885_v1 }
  0x43   : > { %s511_s16 = sld [smem:[#allocation3 + $0xa]]  ;;  %v890_v4 = vstv %s505_s4  ;;  %v175_v6 = vmul.f32 %v887_v2, %v163_v0  ;;  %v220_v47 = vmul.f32 %v520_v44, %v887_v2 }
  0x44   : > { %s512_s18 = sld [smem:[#allocation3 + $0xe]]  ;;  %v185_v8 = vmul.f32 %v890_v4, %v163_v0  ;;  %v911_v16 = vstv %s878_s5  ;;  %v228_v48 = vmul.f32 %v520_v44, %v890_v4 }
  0x45   : > { %s880_s19 = sld [smem:[#allocation3 + $0xb]]  ;;  %v192_v23 = vmul.f32 %v911_v16, %v163_v0  ;;  %v233_v59 = vmul.f32 %v520_v44, %v911_v16 }
  0x46   : > { %s145_s24 = sadd.f32 %s508_s9, %s507_s8 }
  0x47   : > { %s882_s25 = sld [smem:[#allocation3 + $0xf]] }
  0x48   : > { %s148_s21 = sadd.f32 %s510_s11, %s509_s10  ;;  %v892_v5 = vstv %s145_s24 }
  0x49   : > { %s515_s26 = sld [smem:[#allocation3 + $0x4]]  ;;  %v167_v9 = vadd.f32 %v892_v5, %v165_v3  ;;  %v213_v51 = vadd.f32 %v212_v46, %v892_v5 }
  0x4a   : > { %s151_s27 = sadd.f32 %s512_s18, %s511_s16  ;;  %v895_v7 = vstv %s148_s21  ;;  %s503_s16 = sshll.u32 %s868_s28, 3 }
  0x4b   : > { %s516_s3 = sld [smem:[#allocation3 + $0x5]]  ;;  %v177_v13 = vadd.f32 %v895_v7, %v175_v6  ;;  %v221_v52 = vadd.f32 %v220_v47, %v895_v7  ;;  %s532_s18 = sshll.u32 %s796_s0, 7 }
  0x4c   : > { %s517_s6 = sld [smem:[#allocation3 + $0x6]]  ;;  %v899_v10 = vstv %s151_s27  ;;  %s415_s27 = scalar_lea.sflag [#allocation6], %s868_s28 }
  0x4d   : > { %s518_s29 = sld [smem:[#allocation3 + $0x7]]  ;;  %v187_v15 = vadd.f32 %v899_v10, %v185_v8  ;;  %v229_v55 = vadd.f32 %v228_v48, %v899_v10 }
  0x4e   : > { %s154_s30 = sadd.f32 %s882_s25, %s880_s19  ;;  %s138_s19 = scalar_lea.vmem [#allocation7], %s503_s16 }
  0x4f   : > { %v901_v11 = vstv %s515_s26  ;;  %s519_s4 = sld [smem:[#allocation3 + $0x10]]  ;;  %s428_s24 = sshll.u32 %s138_s19, 4  ;;  %s429_s24 = int_to_ptr.vmem [resolvable:$true] %s428_s24 }
  0x50   : > { %v168_v12 = vmul.f32 0.0, %v901_v11  ;;  %v920_v26 = vstv %s154_s30  ;;  %s521_s5 = sld [smem:[#allocation3 + $0x11]]  ;;  %s426_s26 = scalar_lea.hbm %s1030_s2, %s532_s18 }
  0x51   : > { %v907_v14 = vstv %s516_s3  ;;  %v194_v28 = vadd.f32 %v920_v26, %v192_v23  ;;  %v234_v63 = vadd.f32 %v233_v59, %v920_v26  ;;  %s523_s8 = sld [smem:[#allocation3 + $0x12]]  ;;  %s683_s3 = scalar_lea.vmem %s429_s24, 128 }
  0x52   : > { %v913_v17 = vstv %s517_s6  ;;  %v169_v18 = vadd.f32 %v168_v12, %v167_v9  ;;  %v178_v19 = vmul.f32 0.0, %v907_v14  ;;  %s525_s9 = sld [smem:[#allocation3 + $0x13]]  ;;  %p684_p11 = scmp.ne.s32.totalorder %s429_s24, %s683_s3 }
  0x53   : > { %v188_v20 = vmul.f32 0.0, %v913_v17  ;;  %v918_v24 = vstv %s518_s29  ;;  %s529_s10 = sld [smem:[#allocation3 + $0x15]]  ;;  %s756_s6 = smov [#allocation7]  }
  0x54   : > { %v170_v21 = vmul.f32 0.5, %v169_v18  ;;  %v179_v22 = vadd.f32 %v178_v19, %v177_v13  ;;  %v195_v29 = vmul.f32 0.0, %v918_v24  ;;  %s530_s11 = sld [smem:[#allocation3 + $0x16]]  ;;  %p685_p13 = pnand %p684_p11, %p1039_p12 }
  0x55   : > { %v189_v25 = vadd.f32 %v188_v20, %v187_v15  ;;  %s687_s29 = sshll.u32 %s756_s6, 4  ;;  %s688_s29 = int_to_ptr.vmem [resolvable:$false] %s687_s29 }
  0x56   : > { %587 = vtanh.f32 %v170_v21  ;;  %v180_v27 = vmul.f32 0.5, %v179_v22  ;;  %v196_v30 = vadd.f32 %v195_v29, %v194_v28  ;;  %p686_p4 = pneg %p685_p13  ;;  %s689_s0 = scalar_lea.vmem %s688_s29, 256 }
  0x57   : > { %589 = vtanh.f32 %v189_v25  ;;  %p690_p5 = scmp.lt.s32.totalorder %s429_s24, %s688_s29  ;;  %p691_p7 = scmp.lt.s32.totalorder %s689_s0, %s683_s3 }
  0x58   : > { %591 = vtanh.f32 %v180_v27  ;;  %v197_v31 = vmul.f32 0.5, %v196_v30  ;;  %v522_v27 = vld [vmem:[%s872_s7 + $0x10] sm:$0xff] }
  0x59   : > { %v252_v29 = vmul.f32 %v522_v27, %v885_v1  ;;  %v260_v30 = vmul.f32 %v522_v27, %v887_v2  ;;  %v273_v47 = vmul.f32 %v522_v27, %v911_v16  ;;  %p692_p8 = por %p691_p7, %p690_p5 }
  0x5a   : > { %593 = vtanh.f32 %v197_v31  ;;  %v207_v31 = vstv %s519_s4 }
  0x5b   : > { %p693_p10 = pnand %p692_p8, %p686_p4 }
  0x63   : > { %v588_v32 = vpop.eup %587 }
  0x64   : > { %v590_v33 = vpop.eup %589  ;;  %v172_v34 = vmul.f32 0.5, %v588_v32  ;;  %v268_v32 = vmul.f32 %v522_v27, %v890_v4 }
  0x65   : > { %v592_v35 = vpop.eup %591 }
  0x66   : > { %v173_v36 = vadd.f32 0.5, %v172_v34  ;;  %v182_v37 = vmul.f32 0.5, %v592_v35  ;;  %v247_v34 = vstv %s521_s5 }
  0x67   : > { %v594_v42 = vpop.eup %593 }
  0x68   : > { %v183_v38 = vadd.f32 0.5, %v182_v37  ;;  %v202_v39 = vmul.f32 %v590_v33, %v173_v36  ;;  %v199_v43 = vmul.f32 0.5, %v594_v42  ;;  %v253_v37 = vadd.f32 %v252_v29, %v892_v5 }
  0x6a   : > { %v201_v40 = vmul.f32 0.0, %v183_v38  ;;  %v200_v45 = vadd.f32 0.5, %v199_v43  ;;  %v261_v38 = vadd.f32 %v260_v30, %v895_v7 }
  0x6c   : > { %v203_v41 = vadd.f32 %v202_v39, %v201_v40  ;;  %v269_v39 = vadd.f32 %v268_v32, %v899_v10 }
  0x6e   : > { %595 = vtanh.f32 %v203_v41 }
  0x7b   : > { %v596_v49 = vpop.eup %595 }
  0x7c   : > { %v205_v50 = vmul.f32 %v596_v49, %v200_v45 }
  0x7e   : > { %v214_v53 = vmul.f32 %v205_v50, %v901_v11  ;;  %v222_v54 = vmul.f32 %v205_v50, %v907_v14  ;;  %v230_v56 = vmul.f32 %v205_v50, %v913_v17  ;;  %v235_v0 = vmul.f32 %v205_v50, %v918_v24 }
  0x7f   : > { %v208_v35 = vmul.f32 %v207_v31, %v205_v50 }
  0x80   : > { %v215_v57 = vadd.f32 %v214_v53, %v213_v51  ;;  %v223_v58 = vadd.f32 %v222_v54, %v221_v52  ;;  %v231_v62 = vadd.f32 %v230_v56, %v229_v55  ;;  %v236_v3 = vadd.f32 %v235_v0, %v234_v63 }
  0x81   : > { %v274_v51 = vadd.f32 %v273_v47, %v920_v26 }
  0x82   : > { %v216_v60 = vmul.f32 0.5, %v215_v57  ;;  %v224_v61 = vmul.f32 0.5, %v223_v58  ;;  %v237_v6 = vmul.f32 0.5, %v236_v3 }
  0x84   : > { %597 = vtanh.f32 %v216_v60 }
  0x85   : > { %599 = vtanh.f32 %v224_v61 }
  0x86   : > { %601 = vtanh.f32 %v231_v62 }
  0x87   : > { %603 = vtanh.f32 %v237_v6 }
  0x91   : > { %v598_v8 = vpop.eup %597 }
  0x92   : > { %v600_v9 = vpop.eup %599  ;;  %v218_v12 = vmul.f32 0.5, %v598_v8  ;;  %v524_v8 = vld [vmem:[%s872_s7 + $0x18] sm:$0xff] }
  0x93   : > { %v602_v13 = vpop.eup %601  ;;  %v226_v15 = vmul.f32 0.5, %v600_v9 }
  0x94   : > { %v219_v18 = vadd.f32 0.5, %v218_v12  ;;  %v604_v23 = vpop.eup %603  ;;  %v292_v12 = vmul.f32 %v524_v8, %v885_v1 }
  0x95   : > { %v227_v19 = vadd.f32 0.5, %v226_v15  ;;  %v239_v25 = vmul.f32 0.5, %v604_v23  ;;  %v308_v15 = vmul.f32 %v524_v8, %v890_v4 }
  0x96   : > { %v242_v20 = vmul.f32 %v602_v13, %v219_v18  ;;  %v300_v13 = vmul.f32 %v524_v8, %v887_v2 }
  0x97   : > { %v241_v21 = vmul.f32 %v227_v19, %v203_v41  ;;  %v240_v28 = vadd.f32 0.5, %v239_v25  ;;  %v287_v19 = vstv %s523_s8  ;;  %v309_v23 = vadd.f32 %v308_v15, %v899_v10 }
  0x99   : > { %v243_v22 = vadd.f32 %v242_v20, %v241_v21  ;;  %v293_v21 = vadd.f32 %v292_v12, %v892_v5 }
  0x9b   : > { %605 = vtanh.f32 %v243_v22 }
  0xa8   : > { %v606_v33 = vpop.eup %605 }
  0xa9   : > { %v245_v36 = vmul.f32 %v606_v33, %v240_v28  ;;  %v313_v33 = vmul.f32 %v524_v8, %v911_v16 }
  0xab   : > { %v248_v40 = vmul.f32 %v247_v34, %v245_v36  ;;  %v254_v41 = vmul.f32 %v245_v36, %v901_v11  ;;  %v262_v42 = vmul.f32 %v245_v36, %v907_v14  ;;  %v270_v43 = vmul.f32 %v245_v36, %v913_v17 }
  0xac   : > { %v275_v52 = vmul.f32 %v245_v36, %v918_v24 }
  0xad   : > { %v249_v44 = vadd.f32 %v248_v40, %v208_v35  ;;  %v255_v45 = vadd.f32 %v254_v41, %v253_v37  ;;  %v263_v46 = vadd.f32 %v262_v42, %v261_v38  ;;  %v271_v50 = vadd.f32 %v270_v43, %v269_v39 }
  0xae   : > { %v276_v53 = vadd.f32 %v275_v52, %v274_v51  ;;  %v314_v37 = vadd.f32 %v313_v33, %v920_v26 }
  0xaf   : > { %v256_v48 = vmul.f32 0.5, %v255_v45  ;;  %v264_v49 = vmul.f32 0.5, %v263_v46 }
  0xb0   : > { %v277_v54 = vmul.f32 0.5, %v276_v53  ;;  %v526_v53 = vld [vmem:[%s872_s7 + $0x20] sm:$0xff] }
  0xb1   : > { %607 = vtanh.f32 %v256_v48  ;;  %v353_v15 = vmul.f32 %v526_v53, %v911_v16 }
  0xb2   : > { %609 = vtanh.f32 %v264_v49 }
  0xb3   : > { %611 = vtanh.f32 %v271_v50 }
  0xb4   : > { %613 = vtanh.f32 %v277_v54 }
  0xbe   : > { %v608_v55 = vpop.eup %607 }
  0xbf   : > { %v610_v56 = vpop.eup %609  ;;  %v258_v57 = vmul.f32 0.5, %v608_v55  ;;  %v332_v55 = vmul.f32 %v526_v53, %v885_v1 }
  0xc0   : > { %v612_v58 = vpop.eup %611  ;;  %v266_v59 = vmul.f32 0.5, %v610_v56  ;;  %v340_v56 = vmul.f32 %v526_v53, %v887_v2 }
  0xc1   : > { %v259_v60 = vadd.f32 0.5, %v258_v57  ;;  %v614_v3 = vpop.eup %613  ;;  %v348_v57 = vmul.f32 %v526_v53, %v890_v4 }
  0xc2   : > { %v267_v61 = vadd.f32 0.5, %v266_v59  ;;  %v279_v6 = vmul.f32 0.5, %v614_v3  ;;  %v327_v59 = vstv %s525_s9 }
  0xc3   : > { %v282_v62 = vmul.f32 %v612_v58, %v259_v60 }
  0xc4   : > { %v281_v63 = vmul.f32 %v267_v61, %v243_v22  ;;  %v280_v9 = vadd.f32 0.5, %v279_v6  ;;  %v301_v22 = vadd.f32 %v300_v13, %v895_v7  ;;  %v333_v61 = vadd.f32 %v332_v55, %v892_v5 }
  0xc6   : > { %v283_v0 = vadd.f32 %v282_v62, %v281_v63  ;;  %v341_v62 = vadd.f32 %v340_v56, %v895_v7  ;;  %v349_v63 = vadd.f32 %v348_v57, %v899_v10 }
  0xc8   : > { %615 = vtanh.f32 %v283_v0 }
  0xd5   : > { %v616_v18 = vpop.eup %615 }
  0xd6   : > { %v285_v20 = vmul.f32 %v616_v18, %v280_v9 }
  0xd8   : > { %v288_v25 = vmul.f32 %v287_v19, %v285_v20  ;;  %v294_v27 = vmul.f32 %v285_v20, %v901_v11  ;;  %v302_v28 = vmul.f32 %v285_v20, %v907_v14  ;;  %v310_v29 = vmul.f32 %v285_v20, %v913_v17 }
  0xd9   : > { %v315_v38 = vmul.f32 %v285_v20, %v918_v24 }
  0xda   : > { %v289_v30 = vadd.f32 %v288_v25, %v249_v44  ;;  %v295_v31 = vadd.f32 %v294_v27, %v293_v21  ;;  %v303_v32 = vadd.f32 %v302_v28, %v301_v22  ;;  %v311_v36 = vadd.f32 %v310_v29, %v309_v23 }
  0xdb   : > { %v316_v39 = vadd.f32 %v315_v38, %v314_v37  ;;  %v354_v21 = vadd.f32 %v353_v15, %v920_v26  ;;  %v411_v15 = vstv %s530_s11 }
  0xdc   : > { %v296_v34 = vmul.f32 0.5, %v295_v31  ;;  %v304_v35 = vmul.f32 0.5, %v303_v32 }
  0xdd   : > { %v317_v40 = vmul.f32 0.5, %v316_v39  ;;  %v528_v39 = vld [vmem:[%s872_s7 + $0x28] sm:$0xff]  ;;  %s527_s7 = sld [smem:[#allocation3 + $0x14]] }
  0xde   : > { %617 = vtanh.f32 %v296_v34 }
  0xdf   : > { %619 = vtanh.f32 %v304_v35 }
  0xe0   : > { %621 = vtanh.f32 %v311_v36 }
  0xe1   : > { %623 = vtanh.f32 %v317_v40 }
  0xeb   : > { %v618_v41 = vpop.eup %617 }
  0xec   : > { %v620_v42 = vpop.eup %619  ;;  %v298_v43 = vmul.f32 0.5, %v618_v41  ;;  %v372_v41 = vmul.f32 %v528_v39, %v885_v1 }
  0xed   : > { %v622_v44 = vpop.eup %621  ;;  %v306_v45 = vmul.f32 0.5, %v620_v42  ;;  %v380_v42 = vmul.f32 %v528_v39, %v887_v2  ;;  %v393_v2 = vmul.f32 %v528_v39, %v911_v16 }
  0xee   : > { %v299_v46 = vadd.f32 0.5, %v298_v43  ;;  %v624_v51 = vpop.eup %623  ;;  %v388_v43 = vmul.f32 %v528_v39, %v890_v4 }
  0xef   : > { %v307_v47 = vadd.f32 0.5, %v306_v45  ;;  %v319_v52 = vmul.f32 0.5, %v624_v51 }
  0xf0   : > { %v322_v48 = vmul.f32 %v622_v44, %v299_v46  ;;  %v373_v46 = vadd.f32 %v372_v41, %v892_v5  ;;  %v394_v5 = vadd.f32 %v393_v2, %v920_v26 }
  0xf1   : > { %v321_v49 = vmul.f32 %v307_v47, %v283_v0  ;;  %v320_v54 = vadd.f32 0.5, %v319_v52  ;;  %v381_v47 = vadd.f32 %v380_v42, %v895_v7 }
  0xf3   : > { %v323_v50 = vadd.f32 %v322_v48, %v321_v49 }
  0xf5   : > { %625 = vtanh.f32 %v323_v50 }
 0x102   : > { %v626_v58 = vpop.eup %625 }
 0x103   : > { %v325_v60 = vmul.f32 %v626_v58, %v320_v54 }
 0x105   : > { %v328_v0 = vmul.f32 %v327_v59, %v325_v60  ;;  %v334_v3 = vmul.f32 %v325_v60, %v901_v11  ;;  %v342_v6 = vmul.f32 %v325_v60, %v907_v14  ;;  %v350_v8 = vmul.f32 %v325_v60, %v913_v17 }
 0x106   : > { %v355_v22 = vmul.f32 %v325_v60, %v918_v24 }
 0x107   : > { %v973_v9 = vadd.f32 %v328_v0, %v289_v30  ;;  %v335_v12 = vadd.f32 %v334_v3, %v333_v61  ;;  %v343_v13 = vadd.f32 %v342_v6, %v341_v62  ;;  %v351_v20 = vadd.f32 %v350_v8, %v349_v63 }
 0x108   : > { %v356_v23 = vadd.f32 %v355_v22, %v354_v21  ;;  %v367_v62 = vstv %s527_s7  ;;  %v407_v6 = vstv %s529_s10 }
 0x109   : > { %v336_v18 = vmul.f32 0.5, %v335_v12  ;;  %v344_v19 = vmul.f32 0.5, %v343_v13 }
 0x10a   : > { %v357_v25 = vmul.f32 0.5, %v356_v23 }
 0x10b   : > { %627 = vtanh.f32 %v336_v18 }
 0x10c   : > { %629 = vtanh.f32 %v344_v19 }
 0x10d   : > { %631 = vtanh.f32 %v351_v20 }
 0x10e   : > { %633 = vtanh.f32 %v357_v25 }
 0x118   : > { %v628_v27 = vpop.eup %627 }
 0x119   : > { %v630_v28 = vpop.eup %629  ;;  %v338_v29 = vmul.f32 0.5, %v628_v27 }
 0x11a   : > { %v632_v30 = vpop.eup %631  ;;  %v346_v31 = vmul.f32 0.5, %v630_v28 }
 0x11b   : > { %v339_v32 = vadd.f32 0.5, %v338_v29  ;;  %v634_v37 = vpop.eup %633 }
 0x11c   : > { %v347_v33 = vadd.f32 0.5, %v346_v31  ;;  %v359_v38 = vmul.f32 0.5, %v634_v37 }
 0x11d   : > { %v362_v34 = vmul.f32 %v632_v30, %v339_v32 }
 0x11e   : > { %v361_v35 = vmul.f32 %v347_v33, %v323_v50  ;;  %v360_v40 = vadd.f32 0.5, %v359_v38  ;;  %v389_v50 = vadd.f32 %v388_v43, %v899_v10 }
 0x120   : > { %v363_v36 = vadd.f32 %v362_v34, %v361_v35 }
 0x122   : > { %635 = vtanh.f32 %v363_v36 }
 0x12f   : > { %v636_v44 = vpop.eup %635 }
 0x130   : > { %v365_v45 = vmul.f32 %v636_v44, %v360_v40 }
 0x132   : > { %v374_v48 = vmul.f32 %v365_v45, %v901_v11  ;;  %v382_v49 = vmul.f32 %v365_v45, %v907_v14  ;;  %v390_v51 = vmul.f32 %v365_v45, %v913_v17  ;;  %v395_v7 = vmul.f32 %v365_v45, %v918_v24 }
 0x133   : > { %v368_v63 = vmul.f32 %v367_v62, %v365_v45 }
 0x134   : > { %v375_v52 = vadd.f32 %v374_v48, %v373_v46  ;;  %v383_v1 = vadd.f32 %v382_v49, %v381_v47  ;;  %v391_v54 = vadd.f32 %v390_v51, %v389_v50  ;;  %v396_v11 = vadd.f32 %v395_v7, %v394_v5 }
 0x135   : > { %v369_v8 = vadd.f32 %v368_v63, %v973_v9 }
 0x136   : > { %v376_v53 = vmul.f32 0.5, %v375_v52  ;;  %v384_v4 = vmul.f32 0.5, %v383_v1  ;;  %v397_v14 = vmul.f32 0.5, %v396_v11 }
 0x138   : > { %637 = vtanh.f32 %v376_v53 }
 0x139   : > { %639 = vtanh.f32 %v384_v4 }
 0x13a   : > { %641 = vtanh.f32 %v391_v54 }
 0x13b   : > { %643 = vtanh.f32 %v397_v14 }
 0x145   : > { %v638_v55 = vpop.eup %637 }
 0x146   : > { %v640_v10 = vpop.eup %639  ;;  %v378_v17 = vmul.f32 0.5, %v638_v55 }
 0x147   : > { %v642_v56 = vpop.eup %641  ;;  %v386_v57 = vmul.f32 0.5, %v640_v10 }
 0x148   : > { %v379_v16 = vadd.f32 0.5, %v378_v17  ;;  %v644_v26 = vpop.eup %643 }
 0x149   : > { %v387_v58 = vadd.f32 0.5, %v386_v57  ;;  %v399_v24 = vmul.f32 0.5, %v644_v26 }
 0x14a   : > { %v402_v59 = vmul.f32 %v642_v56, %v379_v16 }
 0x14b   : > { %v401_v60 = vmul.f32 %v387_v58, %v363_v36  ;;  %v400_v0 = vadd.f32 0.5, %v399_v24 }
 0x14d   : > { %v403_v61 = vadd.f32 %v402_v59, %v401_v60 }
 0x14f   : > { %645 = vtanh.f32 %v403_v61 }
 0x15c   : > { %v646_v3 = vpop.eup %645 }
 0x15d   : > { %v405_v12 = vmul.f32 %v646_v3, %v400_v0 }
 0x15f   : > { %v408_v13 = vmul.f32 %v407_v6, %v405_v12 }
 0x161   : > { %v409_v18 = vadd.f32 %v408_v13, %v369_v8 }
 0x163   : > { %v412_v19 = vadd.f32 %v411_v15, %v409_v18 }
 0x165   : > { %413 = vst [vmem:[%s138_s19] sm:$0xff] %v412_v19 }
 0x166   : > { %696 = shalt.err (!%p693_p10)
}
 0x167   : > { %s697_s30 = scalar_lea.hbm %s426_s26, 128  ;;  %s701_s5 = scalar_lea.hbm %s1030_s2, 256 }
 0x168   : > { %p698_p1 = scmp.ne.s32.totalorder %s426_s26, %s697_s30  ;;  %p702_p0 = scmp.lt.s32.totalorder %s426_s26, %s1030_s2 }
 0x169   : > { %p703_p2 = scmp.lt.s32.totalorder %s701_s5, %s697_s30 }
 0x16a   : > { %p699_p3 = pnand %p698_p1, %p1039_p12 }
 0x16b   : > { %p704_p6 = por %p703_p2, %p702_p0 }
 0x16c   : > { %p700_p9 = pneg %p699_p3 }
 0x16e   : > { %p705_p11 = pnand %p704_p6, %p700_p9 }
 0x170   : > { %708 = shalt.err (!%p705_p11)
}
 0x171   : > { %539 = dma.vmem_to_hbm [thread:$0]  (%p1039_p12), %s429_s24, 128, %s426_s26, %s415_s27  }
 0x172 PF: > { %s440_s7 = sand.u32 1, %s737_s12   ;;  %p1040_p13 = scmp.ne.s32.totalorder %s1035_s23, 0 }
 0x173   : > { %p1041_p4 = scmp.ge.s32.totalorder %s749_s15, 2  ;;  %s441_s10 = scalar_lea.sflag [#allocation6], %s440_s7 }
 0x175   : > { %p546_p5 = pnand %p1041_p4, %p1040_p13 }
 0x177   : > { %p547_p7 = pneg %p546_p5 }
 0x179   : > { %732 = dma.done.wait (%p547_p7), %s441_s10, 128  }
 0x17a   : > { %734 = vsyncadd (%p547_p7), %s441_s10, 4294967168  ;;  %p19_p8 = scmp.ge.s32.totalorder %s800_s17, 4   ;;  %s1042_s12 = smov %s741_s13 }
 0x17b   : > { %s1043_s13 = smov %s745_s14  ;;  %s1044_s14 = smov %s812_s20 }
 0x17c   : > { %s1045_s15 = smov %s800_s17  ;;  %21 = sbr.rel (!%p19_p8) target bundleno = 10 (0xa), region = 74 }
 0x181   :  { %446 = vsyncpa [#allocation5], 1 }
 0x182   :  { %448 = vsyncpa [#allocation5 + $0x1], 1 }
 0x183   :  { %449 = vsyncpa [#allocation6], 1 }
 0x184   :  { %451 = vsyncpa [#allocation6 + $0x1], 1 }

</bundles_post_ra>
